<compile_context>
chip_gen: v5e
topology: v5e:2x2
jax: 0.10.0
libtpu: 0.0.40
codegen_flags: <defaults>
</compile_context>

<pallas_src>
import jax
import jax.numpy as jnp
from jax.experimental import pallas as pl
from jax.experimental.pallas import tpu as pltpu


def dueling_head_kernel(x_ref, w_h_ref, b_h_ref, w2_ref, b2_ref, out_ref):
    # --- fused hidden stage: both branches' hidden layers in one MXU pass ---
    x = x_ref[...].astype(w_h_ref.dtype)             # in-kernel bf16 cast
    h = jnp.dot(x, w_h_ref[...], preferred_element_type=jnp.float32)
    h = jnp.maximum(h + b_h_ref[...], 0.0)           # bias + ReLU in f32

    # --- fused output stage: dueling combine is pre-folded into w2/b2, so this
    # matmul already yields  value + (advantage - advantage.mean(-1)).
    z = jnp.dot(h.astype(w2_ref.dtype), w2_ref[...],
                preferred_element_type=jnp.float32)
    out_ref[...] = (z + b2_ref[...]).astype(out_ref.dtype)


def fuse_params(params, compute_dtype=jnp.bfloat16):
    """Build fused / combine-folded weights ONCE (outside the per-call path)."""
    w_ah, b_ah = params["w_ah"], params["b_ah"]
    w_vh, b_vh = params["w_vh"], params["b_vh"]
    w_ao, w_vo = params["w_ao"], params["w_vo"]
    b_vo = params["b_vo"]

    D, H = w_ah.shape
    O = w_ao.shape[1]

    # Hidden stage: one [D, 2H] matmul computes both branches.
    w_h = jnp.concatenate([w_ah, w_vh], axis=1)                    # [D, 2H]
    b_h = jnp.concatenate([b_ah, b_vh], axis=1)                    # [1, 2H]

    # Output stage with the dueling combine folded in (f32, before bf16 cast):
    #   out[:, j] = h_a @ (w_ao[:, j] - mean_k w_ao[:, k]) + h_v @ w_vo[:, 0] + b_vo
    # advantage_bias is constant across actions, so the mean subtraction
    # cancels it exactly and it drops out of b2.
    w2_top = w_ao - jnp.mean(w_ao, axis=1, keepdims=True)          # [H, O]
    w2_bot = jnp.broadcast_to(w_vo, (H, O))                        # [H, O]
    w2 = jnp.concatenate([w2_top, w2_bot], axis=0)                 # [2H, O]
    b2 = jnp.broadcast_to(b_vo, (1, O)).astype(jnp.float32)        # [1, O]

    return (w_h.astype(compute_dtype), b_h.astype(jnp.float32),
            w2.astype(compute_dtype), b2)


def dueling_head(x, fused, *, tile_b=512):
    """x: [B, D] float32.  fused: output of fuse_params.  Returns [B, O] f32."""
    w_h, b_h, w2, b2 = fused
    B, D = x.shape
    H2 = w_h.shape[1]
    O = w2.shape[1]

    # Batch tiling.  Pick tile_b so nb >= 2 (v7x megacore) and so the
    # double-buffered streams (~tb*(4*D + 4*O) bytes) + resident weights fit
    # the chip's scoped VMEM (raise vmem_limit_bytes on v5e for tb >= 512).
    tb = min(tile_b, B)
    nb = pl.cdiv(B, tb)
    Bp = nb * tb
    # TODO(synk): handle a ragged last tile with pl.when instead of padding.
    x_in = x if Bp == B else jnp.pad(x, ((0, Bp - B), (0, 0)))

    flops = 2 * Bp * D * H2 + 2 * Bp * H2 * O
    bytes_accessed = (Bp * D * x.dtype.itemsize + Bp * O * 4
                      + w_h.size * w_h.dtype.itemsize + b_h.size * 4
                      + w2.size * w2.dtype.itemsize + b2.size * 4)

    out = pl.pallas_call(
        dueling_head_kernel,
        out_shape=jax.ShapeDtypeStruct((Bp, O), jnp.float32),
        grid_spec=pltpu.PrefetchScalarGridSpec(
            num_scalar_prefetch=0,
            grid=(nb,),
            in_specs=[
                pl.BlockSpec((tb, D), lambda i: (i, 0)),    # x: streamed (f32)
                pl.BlockSpec((D, H2), lambda i: (0, 0)),    # W_h: resident
                pl.BlockSpec((1, H2), lambda i: (0, 0)),    # b_h: resident
                pl.BlockSpec((H2, O), lambda i: (0, 0)),    # W_2: resident (combine folded)
                pl.BlockSpec((1, O), lambda i: (0, 0)),     # b_2: resident
            ],
            out_specs=pl.BlockSpec((tb, O), lambda i: (i, 0)),   # true-width store
        ),
        compiler_params=pltpu.CompilerParams(
            dimension_semantics=("parallel",),   # v7x: 2 TCs split the batch
        ),
        cost_estimate=pl.CostEstimate(flops=int(flops), transcendentals=0,
                                      bytes_accessed=int(bytes_accessed)),
    )(x_in, w_h, b_h, w2, b2)

    return out if Bp == B else out[:B]


def init_params(key, input_size, hidden_size, output_size):
    """Deterministic synthetic init (PyTorch-Linear-style uniform fan-in)."""
    ks = jax.random.split(key, 6)

    def uniform(k, shape, fan_in):
        bound = 1.0 / jnp.sqrt(fan_in)
        return jax.random.uniform(k, shape, jnp.float32, -bound, bound)

    return {
        # advantage hidden: Linear(D, H) + ReLU
        "w_ah": uniform(ks[0], (input_size, hidden_size), input_size),
        "b_ah": uniform(ks[1], (1, hidden_size), input_size),
        # advantage out: Linear(H, O), bias=False
        "w_ao": uniform(ks[2], (hidden_size, output_size), hidden_size),
        # advantage_bias: torch.zeros(1) (cancelled by the mean subtraction)
        "a_bias": jnp.zeros((1, 1), jnp.float32),
        # value MLP: Linear(D, H) + ReLU -> Linear(H, 1)
        "w_vh": uniform(ks[3], (input_size, hidden_size), input_size),
        "b_vh": uniform(ks[4], (1, hidden_size), input_size),
        "w_vo": uniform(ks[5], (hidden_size, 1), hidden_size),
        "b_vo": jnp.zeros((1, 1), jnp.float32),
    }


def dueling_head_ref(x, p):
    """Pure-JAX f32 reference (matches the PyTorch forward)."""
    h_a = jnp.maximum(x @ p["w_ah"] + p["b_ah"], 0.0)
    adv = h_a @ p["w_ao"] + p["a_bias"]
    h_v = jnp.maximum(x @ p["w_vh"] + p["b_vh"], 0.0)
    val = h_v @ p["w_vo"] + p["b_vo"]
    return val + (adv - adv.mean(axis=-1, keepdims=True))


if __name__ == "__main__":
    # batch, input_size, hidden_size, output_size (small, but exercises the grid)
    B, D, H, O = 256, 128, 64, 16

    key = jax.random.PRNGKey(0)
    k_x, k_p = jax.random.split(key)
    x = jax.random.normal(k_x, (B, D), jnp.float32)
    params = init_params(k_p, D, H, O)

    fused = fuse_params(params)                 # prepared once, reused per call
    out = dueling_head(x, fused, tile_b=128)    # nb=2 -> grid + megacore split
    out = jax.block_until_ready(out)

    ref = dueling_head_ref(x, params)
    assert out.shape == (B, O), out.shape
    max_err = float(jnp.max(jnp.abs(out - ref)))
    # bf16 inputs/weights/hidden with f32 accumulation -> loosened tolerance.
    assert max_err < 5e-2, max_err

    print("KERNEL_OK")
</pallas_src>

<mosaic_0001>
module attributes {stable_mosaic.version = 11 : i64} {
  func.func @dueling_head_kernel(%arg0: i32, %arg1: memref<128x128xf32, #tpu.memory_space<vmem>>, %arg2: memref<128x128xbf16, #tpu.memory_space<vmem>>, %arg3: memref<1x128xf32, #tpu.memory_space<vmem>>, %arg4: memref<128x16xbf16, #tpu.memory_space<vmem>>, %arg5: memref<1x16xf32, #tpu.memory_space<vmem>>, %arg6: memref<128x16xf32, #tpu.memory_space<vmem>>) attributes {dimension_semantics = [#tpu.dimension_semantics<parallel>], iteration_bounds = array<i64: 2>, scalar_prefetch = 0 : i64, scratch_operands = 0 : i64, tpu.core_type = #tpu.core_type<tc>, window_params = [{transform_indices = @transform_0, window_bounds = array<i64: 128, 128>}, {pipeline_mode = #tpu.pipeline_mode<synchronous>, transform_indices = @transform_1, window_bounds = array<i64: 128, 128>}, {pipeline_mode = #tpu.pipeline_mode<synchronous>, transform_indices = @transform_2, window_bounds = array<i64: 1, 128>}, {pipeline_mode = #tpu.pipeline_mode<synchronous>, transform_indices = @transform_3, window_bounds = array<i64: 128, 16>}, {pipeline_mode = #tpu.pipeline_mode<synchronous>, transform_indices = @transform_4, window_bounds = array<i64: 1, 16>}, {transform_indices = @transform_5, window_bounds = array<i64: 128, 16>}]} {
    %c0 = arith.constant 0 : index
    %c0_0 = arith.constant 0 : index
    %0 = vector.load %arg1[%c0, %c0_0] : memref<128x128xf32, #tpu.memory_space<vmem>>, vector<128x128xf32>
    %1 = arith.truncf %0 : vector<128x128xf32> to vector<128x128xbf16>
    %c0_1 = arith.constant 0 : index
    %c0_2 = arith.constant 0 : index
    %2 = vector.load %arg2[%c0_1, %c0_2] : memref<128x128xbf16, #tpu.memory_space<vmem>>, vector<128x128xbf16>
    %cst = arith.constant dense<0.000000e+00> : vector<128x128xf32>
    %3 = tpu.matmul %1, %2, %cst {dimension_numbers = #tpu.dot_dimension_numbers<[1], [0], [0], [1], [0, 0, 1, 1], [], []>} : vector<128x128xbf16>, vector<128x128xbf16>, vector<128x128xf32> -> vector<128x128xf32>
    %c0_3 = arith.constant 0 : index
    %c0_4 = arith.constant 0 : index
    %4 = vector.load %arg3[%c0_3, %c0_4] : memref<1x128xf32, #tpu.memory_space<vmem>>, vector<1x128xf32>
    %5 = vector.broadcast %4 : vector<1x128xf32> to vector<128x128xf32>
    %6 = arith.addf %3, %5 : vector<128x128xf32>
    %cst_5 = arith.constant 0.000000e+00 : f32
    %7 = vector.broadcast %cst_5 : f32 to vector<128x128xf32>
    %8 = arith.maximumf %6, %7 : vector<128x128xf32>
    %9 = arith.truncf %8 : vector<128x128xf32> to vector<128x128xbf16>
    %c0_6 = arith.constant 0 : index
    %c0_7 = arith.constant 0 : index
    %10 = vector.load %arg4[%c0_6, %c0_7] : memref<128x16xbf16, #tpu.memory_space<vmem>>, vector<128x16xbf16>
    %cst_8 = arith.constant dense<0.000000e+00> : vector<128x16xf32>
    %11 = tpu.matmul %9, %10, %cst_8 {dimension_numbers = #tpu.dot_dimension_numbers<[1], [0], [0], [1], [0, 0, 1, 1], [], []>} : vector<128x128xbf16>, vector<128x16xbf16>, vector<128x16xf32> -> vector<128x16xf32>
    %c0_9 = arith.constant 0 : index
    %c0_10 = arith.constant 0 : index
    %12 = vector.load %arg5[%c0_9, %c0_10] : memref<1x16xf32, #tpu.memory_space<vmem>>, vector<1x16xf32>
    %13 = vector.broadcast %12 : vector<1x16xf32> to vector<128x16xf32>
    %14 = arith.addf %11, %13 : vector<128x16xf32>
    %c0_11 = arith.constant 0 : index
    %c0_12 = arith.constant 0 : index
    %15 = vector.load %arg6[%c0_11, %c0_12] : memref<128x16xf32, #tpu.memory_space<vmem>>, vector<128x16xf32>
    tpu.vector_store %arg6[%c0_11, %c0_12], %14 {strides = array<i32>} : memref<128x16xf32, #tpu.memory_space<vmem>>, vector<128x16xf32>,
    return
  }
  func.func @transform_0(%arg0: i32) -> (i32, i32) {
    %c0_i32 = arith.constant 0 : i32
    %c0_i32_0 = arith.constant 0 : i32
    return %arg0, %c0_i32 : i32, i32
  }
  func.func @transform_1(%arg0: i32) -> (i32, i32) {
    %c0_i32 = arith.constant 0 : i32
    %c0_i32_0 = arith.constant 0 : i32
    %c0_i32_1 = arith.constant 0 : i32
    return %c0_i32, %c0_i32_0 : i32, i32
  }
  func.func @transform_2(%arg0: i32) -> (i32, i32) {
    %c0_i32 = arith.constant 0 : i32
    %c0_i32_0 = arith.constant 0 : i32
    %c0_i32_1 = arith.constant 0 : i32
    return %c0_i32, %c0_i32_0 : i32, i32
  }
  func.func @transform_3(%arg0: i32) -> (i32, i32) {
    %c0_i32 = arith.constant 0 : i32
    %c0_i32_0 = arith.constant 0 : i32
    %c0_i32_1 = arith.constant 0 : i32
    return %c0_i32, %c0_i32_0 : i32, i32
  }
  func.func @transform_4(%arg0: i32) -> (i32, i32) {
    %c0_i32 = arith.constant 0 : i32
    %c0_i32_0 = arith.constant 0 : i32
    %c0_i32_1 = arith.constant 0 : i32
    return %c0_i32, %c0_i32_0 : i32, i32
  }
  func.func @transform_5(%arg0: i32) -> (i32, i32) {
    %c0_i32 = arith.constant 0 : i32
    %c0_i32_0 = arith.constant 0 : i32
    return %arg0, %c0_i32 : i32, i32
  }
}

</mosaic_0001>

<bundles_post_ra>
// kernel: tpu_custom_call.1
= control target key start
LH: loop header
LB: loop body
LE: loop exit
PB: predicated region body
PF: predicated region fallthrough
CT: control target
= control target key end

     0   :  { %10 = vsyncpa [#allocation3], 0  ;;  %s1063_s0 = inlined_call_operand.hbm [shape: f32[256,128], index: 0, kind: input, shape index: {}]   ;;  %s1064_s1 = inlined_call_operand.vmem [shape: bf16[128,128], index: 1, kind: input, shape index: {}]   ;;  %s1065_s2 = inlined_call_operand.vmem [shape: f32[1,128], index: 2, kind: input, shape index: {}]   ;;  %s1066_s3 = inlined_call_operand.vmem [shape: bf16[128,16], index: 3, kind: input, shape index: {}]   ;;  %s1067_s4 = inlined_call_operand.vmem [shape: f32[1,16], index: 4, kind: input, shape index: {}]   ;;  %s1068_s5 = inlined_call_operand.vmem [shape: f32[256,16], index: 5, kind: output, shape index: {}]  }
   0x1   :  { %12 = vsyncpa [#allocation3 + $0x1], 0  ;;  %s866_s18 = smov 0   ;;  %s868_s19 = smov 0  }
   0x2   :  { %s870_s20 = smov 0   ;;  %s872_s21 = smov 0  }
   0x3 LB: > { %s615_s22 = sadd.s32 4294967295, %s832_s21   ;;  %s886_s23 = sadd.s32 1, %s832_s21   ;;  %s832_s21 = sphi %s872_s21, %s1075_s21   ;;  %s828_s20 = sphi %s870_s20, %s1074_s20   ;;  %s824_s19 = sphi %s868_s19, %s1073_s19   ;;  %s820_s18 = sphi %s866_s18, %s1072_s18  }
   0x4   : > { %s22_s24 = ssub.s32 %s832_s21, %s886_s23  ;;  %s25_s25 = sadd.s32 1, %s828_s20 }
   0x5   : > { %p23_p0 = scmp.eq.s32.totalorder %s22_s24, 0  ;;  %p32_p1 = scmp.ne.s32.totalorder %s828_s20, %s824_s19 }
   0x6   : > { %p33_p2 = scmp.eq.s32.totalorder %s832_s21, 0  ;;  %p38_p3 = scmp.ne.s32.totalorder %s824_s19, %s820_s18 }
   0x7   : > { %s896_s26 = scalar_select %p23_p0, %s828_s20, %s25_s25  }
   0x8   : > { %p898_p4 = por %p33_p2, %p32_p1  ;;  %p39_p5 = scmp.eq.s32.totalorder %s615_s22, 0 }
   0x9   : > { %p731_p6 = scmp.lt.s32.totalorder %s832_s21, 2  ;;  %s184_s29 = sand.u32 1, %s828_s20  }
   0xa   : > { %p905_p7 = por %p39_p5, %p38_p3  ;;  %s619_s30 = sshll.u32 %s184_s29, 7 }
   0xb   : > { %s692_s6 = sshll.u32 %s832_s21, 7  ;;  %s188_s10 = scalar_lea.vmem [#allocation2], %s619_s30 }
   0xc   : > { %s193_s9 = scalar_lea.hbm %s1063_s0, %s692_s6  ;;  %s196_s11 = sshll.u32 %s188_s10, 4  ;;  %s197_s11 = int_to_ptr.vmem [resolvable:$true] %s196_s11 }
   0xd   : > { %s194_s12 = sshll.u32 %s193_s9, 4  ;;  %p916_p8 = pnand %p731_p6, %p898_p4  ;;  %s195_s12 = int_to_ptr.hbm [resolvable:$true] %s194_s12 }
   0xe   : > { %p622_p9 = scmp.ge.s32.totalorder %s832_s21, 1  ;;  %s185_s14 = scalar_lea.sflag [#allocation3], %s184_s29 }
   0xf   : > { %s768_s15 = sshra.s32 %s195_s12, 4  ;;  %p772_p11 = pneg %p916_p8  ;;  %s769_s15 = int_to_ptr.hbm [resolvable:$true] %s768_s15 }
  0x10   : > { %s770_s16 = scalar_lea.hbm %s769_s15, 128  ;;  %s775_s24 = scalar_lea.hbm %s1063_s0, 256 }
  0x11   : > { %p771_p10 = scmp.ne.s32.totalorder %s769_s15, %s770_s16  ;;  %p776_p0 = scmp.lt.s32.totalorder %s769_s15, %s1063_s0 }
  0x12   : > { %p777_p1 = scmp.lt.s32.totalorder %s775_s24, %s770_s16 }
  0x13   : > { %p773_p12 = pnand %p772_p11, %p771_p10 }
  0x14   : > { %p778_p2 = por %p777_p1, %p776_p0 }
  0x15   : > { %p774_p13 = pneg %p773_p12 }
  0x17   : > { %p779_p3 = pnand %p778_p2, %p774_p13 }
  0x19   : > { %782 = shalt.err (!%p779_p3)
}
  0x1a   : > { %s834_s29 = smov 128   ;;  %s835_s30 = smov 8  }
  0x1b   : > { %730 = dma.hbm_to_vmem [thread:$0]  (!%p916_p8), %s195_s12, 2048, %s197_s11, %s185_s14, %s834_s29, %s834_s29, %s835_s30  }
  0x1c   : > { %p204_p4 = scmp.lt.s32.totalorder %s832_s21, 3 }
  0x1e   : > { %p205_p5 = pnand %p622_p9, %p204_p4 }
  0x1f   : > { %s210_s6 = sand.u32 (!%p205_p5), 1, %s824_s19  }
  0x20   : > { %208 = sbr.rel (%p205_p5) target bundleno = 407 (0x197), region = 40  ;;  %s623_s7 = sshll.u32 (!%p205_p5), %s210_s6, 7 }
  0x21   : > { %s211_s8 = scalar_lea.sflag (!%p205_p5), [#allocation3], %s210_s6  ;;  %s935_s9 = scalar_lea.vmem (!%p205_p5), [#allocation2], %s623_s7 }
  0x25   : > { %815 = dma.done.wait (%p905_p7), %s211_s8, 2048  }
  0x26   : > { %817 = vsyncadd (%p905_p7), %s211_s8, 4294965248  ;;  %v700_v0 = vld [vmem:[%s1064_s1 + $0x38] sm:$0xff]  ;;  %v699_v1 = vld [vmem:[%s1064_s1 + $0x30] sm:$0xff]  ;;  %s624_s6 = sshll.u32 %s615_s22, 4  ;;  %vm531_vm0 = vcmask 130048  }
  0x27   : > { %341 = vmatpush.bf16.msra.mxu0 %v700_v0  ;;  %709 = vmatpush.bf16.msra.mxu2 %v700_v0  ;;  %v698_v2 = vld [vmem:[%s1064_s1 + $0x28] sm:$0xff]  ;;  %v697_v3 = vld [vmem:[%s1064_s1 + $0x20] sm:$0xff]  ;;  %v696_v4 = vld [vmem:[%s1064_s1 + $0x18] sm:$0xff]  ;;  %p244_p6 = scmp.lt.s32.totalorder %s624_s6, 31 }
  0x28   : > { %v695_v5 = vld [vmem:[%s1064_s1 + $0x10] sm:$0xff]  ;;  %v694_v6 = vld [vmem:[%s1064_s1 + $0x8] sm:$0xff]  ;;  %v693_v7 = vld [vmem:[%s1064_s1] sm:$0xff] }
  0x29   : > { %v249_v8 = vld [vmem:[%s935_s9] sm:$0xff]  ;;  %v250_v9 = vld [vmem:[%s935_s9 + $0x8] sm:$0xff]  ;;  %v251_v14 = vld [vmem:[%s935_s9 + $0x10] sm:$0xff]  ;;  %s1077_s6 = smov (!%p244_p6, %s624_s6), 31 }
  0x2a   : > { %v257_v10 = vld [vmem:[%s935_s9 + $0x40] sm:$0xff]  ;;  %v258_v11 = vld [vmem:[%s935_s9 + $0x48] sm:$0xff]  ;;  %v265_v12 = vpack.c.bf16 %v250_v9, %v249_v8  ;;  %v252_v15 = vld [vmem:[%s935_s9 + $0x18] sm:$0xff]  ;;  %s625_s7 = sshll.u32 %s1077_s6, 3 }
  0x2b   : > { %342 = vmatpush.bf16.msra.mxu0 %v699_v1  ;;  %710 = vmatpush.bf16.msra.mxu2 %v699_v1  ;;  %v269_v13 = vpack.c.bf16 %v258_v11, %v257_v10  ;;  %v259_v16 = vld [vmem:[%s935_s9 + $0x50] sm:$0xff]  ;;  %v260_v17 = vld [vmem:[%s935_s9 + $0x58] sm:$0xff]  ;;  %v266_v18 = vpack.c.bf16 %v252_v15, %v251_v14  ;;  %v706_v22 = vld [vmem:[%s1066_s3 + $0x28] sm:$0xff]  ;;  %s1016_s12 = scalar_lea.vmem %s1068_s5, %s625_s7 }
  0x2c   : > { %v270_v19 = vpack.c.bf16 %v260_v17, %v259_v16  ;;  %v708_v20 = vld [vmem:[%s1066_s3 + $0x38] sm:$0xff]  ;;  %v707_v21 = vld [vmem:[%s1066_s3 + $0x30] sm:$0xff]  ;;  %v253_v23 = vld [vmem:[%s935_s9 + $0x20] sm:$0xff] }
  0x2d   : > { %482 = vmatpush.bf16.msra.mxu1 %v708_v20  ;;  %717 = vmatpush.bf16.msra.mxu3 %v708_v20  ;;  %v254_v24 = vld [vmem:[%s935_s9 + $0x28] sm:$0xff]  ;;  %v261_v25 = vld [vmem:[%s935_s9 + $0x60] sm:$0xff]  ;;  %v255_v30 = vld [vmem:[%s935_s9 + $0x30] sm:$0xff] }
  0x2e   : > { %v262_v26 = vld [vmem:[%s935_s9 + $0x68] sm:$0xff]  ;;  %v705_v27 = vld [vmem:[%s1066_s3 + $0x20] sm:$0xff]  ;;  %v267_v28 = vpack.c.bf16 %v254_v24, %v253_v23  ;;  %v256_v31 = vld [vmem:[%s935_s9 + $0x38] sm:$0xff] }
  0x2f   : > { %343 = vmatpush.bf16.msra.mxu0 %v698_v2  ;;  %711 = vmatpush.bf16.msra.mxu2 %v698_v2  ;;  %v271_v29 = vpack.c.bf16 %v262_v26, %v261_v25  ;;  %v263_v32 = vld [vmem:[%s935_s9 + $0x70] sm:$0xff]  ;;  %v264_v33 = vld [vmem:[%s935_s9 + $0x78] sm:$0xff]  ;;  %v268_v34 = vpack.c.bf16 %v256_v31, %v255_v30  ;;  %v702_v38 = vld [vmem:[%s1066_s3 + $0x8] sm:$0xff] }
  0x30   : > { %v272_v35 = vpack.c.bf16 %v264_v33, %v263_v32  ;;  %v704_v36 = vld [vmem:[%s1066_s3 + $0x18] sm:$0xff]  ;;  %v703_v37 = vld [vmem:[%s1066_s3 + $0x10] sm:$0xff]  ;;  %v701_v39 = vld [vmem:[%s1066_s3] sm:$0xff] }
  0x31   : > { %483 = vmatpush.bf16.msra.mxu1 %v707_v21  ;;  %718 = vmatpush.bf16.msra.mxu3 %v707_v21  ;;  %v766_v41 = vld [vmem:[%s1065_s2] ss:$0 sm:$0xff] }
  0x32   : > { %v767_v33 = vld [vmem:[%s1067_s4] ss:$0 sm:$0xff] }
  0x33   : > { %344 = vmatpush.bf16.msra.mxu0 %v697_v3  ;;  %712 = vmatpush.bf16.msra.mxu2 %v697_v3 }
  0x35   : > { %484 = vmatpush.bf16.msra.mxu1 %v706_v22  ;;  %719 = vmatpush.bf16.msra.mxu3 %v706_v22 }
  0x37   : > { %345 = vmatpush.bf16.msra.mxu0 %v696_v4  ;;  %713 = vmatpush.bf16.msra.mxu2 %v696_v4 }
  0x39   : > { %485 = vmatpush.bf16.msra.mxu1 %v705_v27  ;;  %720 = vmatpush.bf16.msra.mxu3 %v705_v27 }
  0x3b   : > { %346 = vmatpush.bf16.msra.mxu0 %v695_v5  ;;  %714 = vmatpush.bf16.msra.mxu2 %v695_v5 }
  0x3d   : > { %486 = vmatpush.bf16.msra.mxu1 %v704_v36  ;;  %721 = vmatpush.bf16.msra.mxu3 %v704_v36 }
  0x3f   : > { %347 = vmatpush.bf16.msra.mxu0 %v694_v6  ;;  %715 = vmatpush.bf16.msra.mxu2 %v694_v6 }
  0x41   : > { %487 = vmatpush.bf16.msra.mxu1 %v703_v37  ;;  %722 = vmatpush.bf16.msra.mxu3 %v703_v37 }
  0x43   : > { %348 = vmatpush.bf16.msra.mxu0 %v693_v7  ;;  %716 = vmatpush.bf16.msra.mxu2 %v693_v7 }
  0x45   : > { %488 = vmatpush.bf16.msra.mxu1 %v702_v38  ;;  %723 = vmatpush.bf16.msra.mxu3 %v702_v38 }
  0x46   : > { %349 = vmatmul.bf16.vlgmr.msra.gmra.mxu0 %v265_v12  ;;  %369 = vmatmul.bf16.vlgmr.msra.gmra.mxu2 %v269_v13 }
  0x49   : > { %489 = vmatpush.bf16.msra.mxu1 %v701_v39  ;;  %724 = vmatpush.bf16.msra.mxu3 %v701_v39 }
  0x56   : > { %354 = vmatmul.bf16.gmra.mxu0 %v266_v18  ;;  %374 = vmatmul.bf16.gmra.mxu2 %v270_v19 }
  0x66   : > { %359 = vmatmul.bf16.gmra.mxu0 %v267_v28  ;;  %379 = vmatmul.bf16.gmra.mxu2 %v271_v29 }
  0x76   : > { %364 = vmatmul.bf16.gmra.mxu0 %v268_v34  ;;  %384 = vmatmul.bf16.gmra.mxu2 %v272_v35 }
  0xc3   : > { %v350_v40 = vpop.f32.mrf.mxu0 }
  0xc4   : > { %v351_v42 = vadd.f32 %v766_v41, %v350_v40 }
  0xc6   : > { %v390_v45 = vmax.f32 %v351_v42, 0.0 }
  0xc9   : > { %v370_v43 = vpop.f32.mrf.mxu2 }
  0xca   : > { %v371_v48 = vadd.f32 %v766_v41, %v370_v43 }
  0xcb   : > { %v352_v44 = vpop.f32.mrf.mxu0 }
  0xcc   : > { %v353_v46 = vadd.f32 %v766_v41, %v352_v44  ;;  %v398_v53 = vmax.f32 %v371_v48, 0.0 }
  0xce   : > { %v391_v47 = vmax.f32 %v353_v46, 0.0 }
  0xd0   : > { %v406_v49 = vpack.c.bf16 %v391_v47, %v390_v45 }
  0xd1   : > { %v372_v50 = vpop.f32.mrf.mxu2 }
  0xd2   : > { %v373_v51 = vadd.f32 %v766_v41, %v372_v50  ;;  %490 = vmatmul.bf16.vlgmr.msra.gmra.mxu1 %v406_v49 }
  0xd3   : > { %v355_v52 = vpop.f32.mrf.mxu0 }
  0xd4   : > { %v399_v54 = vmax.f32 %v373_v51, 0.0  ;;  %v356_v56 = vadd.f32 %v766_v41, %v355_v52 }
  0xd6   : > { %v410_v55 = vpack.c.bf16 %v399_v54, %v398_v53  ;;  %v392_v59 = vmax.f32 %v356_v56, 0.0 }
  0xd8   : > { %510 = vmatmul.bf16.vlgmr.msra.gmra.mxu3 %v410_v55 }
  0xd9   : > { %v375_v57 = vpop.f32.mrf.mxu2 }
  0xda   : > { %v376_v62 = vadd.f32 %v766_v41, %v375_v57 }
  0xdb   : > { %v357_v58 = vpop.f32.mrf.mxu0 }
  0xdc   : > { %v358_v60 = vadd.f32 %v766_v41, %v357_v58  ;;  %v400_v3 = vmax.f32 %v376_v62, 0.0 }
  0xde   : > { %v393_v61 = vmax.f32 %v358_v60, 0.0 }
  0xe0   : > { %v407_v63 = vpack.c.bf16 %v393_v61, %v392_v59 }
  0xe1   : > { %v377_v0 = vpop.f32.mrf.mxu2 }
  0xe2   : > { %v378_v1 = vadd.f32 %v766_v41, %v377_v0  ;;  %495 = vmatmul.bf16.gmra.mxu1 %v407_v63 }
  0xe3   : > { %v360_v2 = vpop.f32.mrf.mxu0 }
  0xe4   : > { %v401_v4 = vmax.f32 %v378_v1, 0.0  ;;  %v361_v6 = vadd.f32 %v766_v41, %v360_v2 }
  0xe6   : > { %v411_v5 = vpack.c.bf16 %v401_v4, %v400_v3  ;;  %v394_v9 = vmax.f32 %v361_v6, 0.0 }
  0xe8   : > { %515 = vmatmul.bf16.gmra.mxu3 %v411_v5 }
  0xe9   : > { %v380_v7 = vpop.f32.mrf.mxu2 }
  0xea   : > { %v381_v12 = vadd.f32 %v766_v41, %v380_v7 }
  0xeb   : > { %v362_v8 = vpop.f32.mrf.mxu0 }
  0xec   : > { %v363_v10 = vadd.f32 %v766_v41, %v362_v8  ;;  %v402_v17 = vmax.f32 %v381_v12, 0.0 }
  0xee   : > { %v395_v11 = vmax.f32 %v363_v10, 0.0 }
  0xf0   : > { %v408_v13 = vpack.c.bf16 %v395_v11, %v394_v9 }
  0xf1   : > { %v382_v14 = vpop.f32.mrf.mxu2 }
  0xf2   : > { %v383_v15 = vadd.f32 %v766_v41, %v382_v14  ;;  %500 = vmatmul.bf16.gmra.mxu1 %v408_v13 }
  0xf3   : > { %v365_v16 = vpop.f32.mrf.mxu0 }
  0xf4   : > { %v403_v18 = vmax.f32 %v383_v15, 0.0  ;;  %v366_v20 = vadd.f32 %v766_v41, %v365_v16 }
  0xf6   : > { %v412_v19 = vpack.c.bf16 %v403_v18, %v402_v17  ;;  %v396_v23 = vmax.f32 %v366_v20, 0.0 }
  0xf8   : > { %520 = vmatmul.bf16.gmra.mxu3 %v412_v19 }
  0xf9   : > { %v385_v21 = vpop.f32.mrf.mxu2 }
  0xfa   : > { %v386_v26 = vadd.f32 %v766_v41, %v385_v21 }
  0xfb   : > { %v367_v22 = vpop.f32.mrf.mxu0 }
  0xfc   : > { %v368_v24 = vadd.f32 %v766_v41, %v367_v22  ;;  %v404_v30 = vmax.f32 %v386_v26, 0.0 }
  0xfe   : > { %v397_v25 = vmax.f32 %v368_v24, 0.0 }
 0x100   : > { %v409_v27 = vpack.c.bf16 %v397_v25, %v396_v23 }
 0x101   : > { %v387_v28 = vpop.f32.mrf.mxu2 }
 0x102   : > { %v388_v29 = vadd.f32 %v766_v41, %v387_v28  ;;  %505 = vmatmul.bf16.gmra.mxu1 %v409_v27 }
 0x104   : > { %v405_v31 = vmax.f32 %v388_v29, 0.0 }
 0x106   : > { %v413_v32 = vpack.c.bf16 %v405_v31, %v404_v30 }
 0x108   : > { %525 = vmatmul.bf16.gmra.mxu3 %v413_v32 }
 0x14f   : > { %v491_v34 = vpop.f32.mrf.mxu1 }
 0x150   : > { %v492_v35 = vadd.f32 %v767_v33, %v491_v34 }
 0x152   : > { %532 = vst.msk [vmem:[%s1016_s12] sm:$0xff] %vm531_vm0, %v492_v35 }
 0x157   : > { %v493_v36 = vpop.f32.mrf.mxu1 }
 0x158   : > { %v494_v37 = vadd.f32 %v767_v33, %v493_v36 }
 0x15a   : > { %533 = vst.msk [vmem:[%s1016_s12 + $0x8] sm:$0xff] %vm531_vm0, %v494_v37 }
 0x15b   : > { %v511_v38 = vpop.f32.mrf.mxu3 }
 0x15c   : > { %v512_v39 = vadd.f32 %v767_v33, %v511_v38 }
 0x15e   : > { %540 = vst.msk [vmem:[%s1016_s12 + $0x40] sm:$0xff] %vm531_vm0, %v512_v39 }
 0x15f   : > { %v496_v40 = vpop.f32.mrf.mxu1 }
 0x160   : > { %v497_v41 = vadd.f32 %v767_v33, %v496_v40 }
 0x162   : > { %534 = vst.msk [vmem:[%s1016_s12 + $0x10] sm:$0xff] %vm531_vm0, %v497_v41 }
 0x163   : > { %v513_v42 = vpop.f32.mrf.mxu3 }
 0x164   : > { %v514_v43 = vadd.f32 %v767_v33, %v513_v42 }
 0x166   : > { %541 = vst.msk [vmem:[%s1016_s12 + $0x48] sm:$0xff] %vm531_vm0, %v514_v43 }
 0x167   : > { %v498_v44 = vpop.f32.mrf.mxu1 }
 0x168   : > { %v499_v45 = vadd.f32 %v767_v33, %v498_v44 }
 0x16a   : > { %535 = vst.msk [vmem:[%s1016_s12 + $0x18] sm:$0xff] %vm531_vm0, %v499_v45 }
 0x16b   : > { %v516_v46 = vpop.f32.mrf.mxu3 }
 0x16c   : > { %v517_v47 = vadd.f32 %v767_v33, %v516_v46 }
 0x16e   : > { %542 = vst.msk [vmem:[%s1016_s12 + $0x50] sm:$0xff] %vm531_vm0, %v517_v47 }
 0x16f   : > { %v501_v48 = vpop.f32.mrf.mxu1 }
 0x170   : > { %v502_v49 = vadd.f32 %v767_v33, %v501_v48 }
 0x172   : > { %536 = vst.msk [vmem:[%s1016_s12 + $0x20] sm:$0xff] %vm531_vm0, %v502_v49 }
 0x173   : > { %v518_v50 = vpop.f32.mrf.mxu3 }
 0x174   : > { %v519_v51 = vadd.f32 %v767_v33, %v518_v50 }
 0x176   : > { %543 = vst.msk [vmem:[%s1016_s12 + $0x58] sm:$0xff] %vm531_vm0, %v519_v51 }
 0x177   : > { %v503_v52 = vpop.f32.mrf.mxu1 }
 0x178   : > { %v504_v53 = vadd.f32 %v767_v33, %v503_v52 }
 0x17a   : > { %537 = vst.msk [vmem:[%s1016_s12 + $0x28] sm:$0xff] %vm531_vm0, %v504_v53 }
 0x17b   : > { %v521_v54 = vpop.f32.mrf.mxu3 }
 0x17c   : > { %v522_v55 = vadd.f32 %v767_v33, %v521_v54 }
 0x17e   : > { %544 = vst.msk [vmem:[%s1016_s12 + $0x60] sm:$0xff] %vm531_vm0, %v522_v55 }
 0x17f   : > { %v506_v56 = vpop.f32.mrf.mxu1 }
 0x180   : > { %v507_v57 = vadd.f32 %v767_v33, %v506_v56 }
 0x182   : > { %538 = vst.msk [vmem:[%s1016_s12 + $0x30] sm:$0xff] %vm531_vm0, %v507_v57 }
 0x183   : > { %v523_v58 = vpop.f32.mrf.mxu3 }
 0x184   : > { %v524_v59 = vadd.f32 %v767_v33, %v523_v58 }
 0x186   : > { %545 = vst.msk [vmem:[%s1016_s12 + $0x68] sm:$0xff] %vm531_vm0, %v524_v59 }
 0x187   : > { %v508_v60 = vpop.f32.mrf.mxu1 }
 0x188   : > { %v509_v61 = vadd.f32 %v767_v33, %v508_v60 }
 0x18a   : > { %539 = vst.msk [vmem:[%s1016_s12 + $0x38] sm:$0xff] %vm531_vm0, %v509_v61 }
 0x18b   : > { %v526_v62 = vpop.f32.mrf.mxu3 }
 0x18c   : > { %v527_v63 = vadd.f32 %v767_v33, %v526_v62 }
 0x18e   : > { %546 = vst.msk [vmem:[%s1016_s12 + $0x70] sm:$0xff] %vm531_vm0, %v527_v63 }
 0x193   : > { %v528_v0 = vpop.f32.mrf.mxu3 }
 0x194   : > { %v529_v1 = vadd.f32 %v767_v33, %v528_v0 }
 0x196   : > { %547 = vst.msk [vmem:[%s1016_s12 + $0x78] sm:$0xff] %vm531_vm0, %v529_v1 }
 0x197 PF: > { %p15_p7 = scmp.ge.s32.totalorder %s886_s23, 4   ;;  %s1072_s18 = smov %s824_s19 }
 0x198   : > { %s1073_s19 = smov %s828_s20  ;;  %s1074_s20 = smov %s896_s26 }
 0x199   : > { %s1075_s21 = smov %s886_s23  ;;  %17 = sbr.rel (!%p15_p7) target bundleno = 3 (0x3), region = 80 }
 0x19e   :  { %570 = vsyncpa [#allocation3], 1 }
 0x19f   :  { %572 = vsyncpa [#allocation3 + $0x1], 1 }

</bundles_post_ra>
